<compile_context>
chip_gen: v7x
topology: tpu7x:2x2x1
jax: 0.10.0
libtpu: 0.0.40
codegen_flags: <defaults>
</compile_context>

<pallas_src>
import functools

import jax
import jax.numpy as jnp
import numpy as np
from jax import lax
from jax.experimental import pallas as pl
from jax.experimental.pallas import tpu as pltpu


def _round_up(x, m):
    return (x + m - 1) // m * m


def _pick_tile_m(nhw, k, cp, target):
    """Row-tile size: multiple of 128, >=2 grid steps when possible, and a
    working set that fits comfortably under v7x's 32 MiB scoped VMEM."""
    n128 = _round_up(nhw, 128)
    tm = min(_round_up(target, 128), n128)
    if n128 > 128:
        # v7x has 2 TensorCores sharing the "parallel" grid axis: keep G >= 2.
        tm = min(tm, _round_up(-(-n128 // 2), 128))
    budget = 24 * 1024 * 1024  # conservative vs v7x 32 MiB scoped default

    def working_set(t):
        return (2 * t * k * 2        # double-buffered bf16 patch tile
                + 2 * k * cp * 2     # double-buffered bf16 weight tile
                + 3 * t * cp * 4)    # pass-2 fp32 out (2 bufs) + fp32 acc

    while tm > 128 and working_set(tm) > budget:
        tm -= 128
    return max(tm, 128)


def _conv_stats_kernel(p_ref, w_ref, sum_ref, sq_ref, *, tm, cp):
    # One im2col matmul per row tile: [TM, K]bf16 @ [K, Cp]bf16 -> fp32 [TM, Cp].
    acc = jnp.dot(p_ref[...], w_ref[...], preferred_element_type=jnp.float32)
    # Per-tile partial BN statistics, folded onto 8 sublanes (VPU adds only;
    # the final tiny [G*8, Cp] reduction runs in plain JAX outside).
    folded = acc.reshape(tm // 8, 8, cp)
    sum_ref[...] = jnp.sum(folded, axis=0)
    sq_ref[...] = jnp.sum(folded * folded, axis=0)


def _conv_bn_relu_kernel(p_ref, w_ref, scale_ref, shift_ref, o_ref):
    # Recompute the (identical) conv matmul, then one fma + one max per elem.
    acc = jnp.dot(p_ref[...], w_ref[...], preferred_element_type=jnp.float32)
    o_ref[...] = jnp.maximum(acc * scale_ref[...] + shift_ref[...],
                             0.0).astype(o_ref.dtype)


def basic_conv_forward(x_nchw, weight, gamma, beta, *, padding=1, eps=1e-5,
                       tile_m=1024):
    """BasicConv forward: conv(no bias) + BN(train batch stats) + ReLU.

    x_nchw : [N, Cin, H, W] float32
    weight : [Cout, Cin, KH, KW] float32  (stride=1, dilation=1, groups=1)
    gamma, beta : [Cout] float32
    returns: [N, Cout, Ho, Wo] float32
    """
    N, Cin, H, W = x_nchw.shape
    Cout, wcin, KH, KW = weight.shape
    assert wcin == Cin, "groups != 1 not implemented"
    Ho = H + 2 * padding - (KH - 1)
    Wo = W + 2 * padding - (KW - 1)
    NHW = N * Ho * Wo
    K = KH * KW * Cin                       # natural, un-padded contraction dim
    Cp = _round_up(Cout, 128)               # lane-dense output channels

    TM = _pick_tile_m(NHW, K, Cp, tile_m)
    assert TM % 128 == 0 and TM % 8 == 0
    Mp = _round_up(NHW, TM)
    G = Mp // TM

    # ---- XLA glue: NCHW -> NHWC (bf16), zero-pad, im2col -------------------
    # TODO(synk): build the patch tile inside pass 1 from a halo'd NHWC row
    # block (and keep NHWC end-to-end) to avoid materializing the KH*KW x
    # input blow-up in HBM; kept as wrapper glue here.
    x_nhwc = jnp.transpose(x_nchw, (0, 2, 3, 1)).astype(jnp.bfloat16)
    x_sp = jnp.pad(x_nhwc, ((0, 0), (padding, padding), (padding, padding), (0, 0)))
    taps = [x_sp[:, kh:kh + Ho, kw:kw + Wo, :]
            for kh in range(KH) for kw in range(KW)]
    patches = jnp.concatenate(taps, axis=-1).reshape(NHW, K)   # (kh, kw, cin)
    patches = jnp.pad(patches, ((0, Mp - NHW), (0, 0)))        # zero rows only

    # [Cout, Cin, KH, KW] -> [K, Cout] (same (kh,kw,cin) order) -> pad -> [K, Cp]
    w_flat = jnp.transpose(weight, (2, 3, 1, 0)).reshape(K, Cout)
    w_flat = jnp.pad(w_flat.astype(jnp.bfloat16), ((0, 0), (0, Cp - Cout)))

    row_spec = pl.BlockSpec((TM, K), lambda i: (i, 0))     # K = full dim (exception)
    # Grid-invariant weight block (never re-DMA'd).  Small here; for very
    # large Cin/Cout on v7x consider pipeline_mode=pl.Buffered(1) to drop the
    # second VMEM copy.
    w_spec = pl.BlockSpec((K, Cp), lambda i: (0, 0))

    # ---- pass 1: conv matmul + per-tile partial sum / sum-of-squares -------
    psum, psq = pl.pallas_call(
        functools.partial(_conv_stats_kernel, tm=TM, cp=Cp),
        out_shape=(
            jax.ShapeDtypeStruct((G * 8, Cp), jnp.float32),
            jax.ShapeDtypeStruct((G * 8, Cp), jnp.float32),
        ),
        grid=(G,),
        in_specs=[row_spec, w_spec],
        out_specs=(
            pl.BlockSpec((8, Cp), lambda i: (i, 0)),
            pl.BlockSpec((8, Cp), lambda i: (i, 0)),
        ),
        compiler_params=pltpu.CompilerParams(
            dimension_semantics=("parallel",)),
    )(patches, w_flat)

    # ---- BN statistics: tiny [G*8, Cp] reductions, plain JAX ---------------
    # Padded rows/channels are exactly zero, so dividing by the real NHW is
    # exact.  Biased batch variance, matching PyTorch train-mode BN forward.
    # TODO(synk): E[x^2]-E[x]^2 in fp32; switch to a centered/Welford combine
    # if conv outputs ever have mean >> std.
    total = jnp.sum(psum, axis=0)
    total_sq = jnp.sum(psq, axis=0)
    mean = total / NHW
    var = total_sq / NHW - mean * mean
    inv = lax.rsqrt(var + eps)
    g = jnp.pad(gamma.astype(jnp.float32), (0, Cp - Cout))
    b = jnp.pad(beta.astype(jnp.float32), (0, Cp - Cout))
    scale = (g * inv).reshape(1, Cp)
    shift = (b - mean * g * inv).reshape(1, Cp)

    # ---- pass 2: recompute conv, fuse scale/shift + ReLU -------------------
    # TODO(synk): for tiny Cout a channel-major (in-kernel transposed) output
    # block would avoid writing Cp/Cout x extra padded lanes; kept lane-dense
    # [TM, Cp] here for robustness.
    out = pl.pallas_call(
        _conv_bn_relu_kernel,
        out_shape=jax.ShapeDtypeStruct((Mp, Cp), jnp.float32),
        grid=(G,),
        in_specs=[row_spec, w_spec,
                  pl.BlockSpec((1, Cp), lambda i: (0, 0)),
                  pl.BlockSpec((1, Cp), lambda i: (0, 0))],
        out_specs=pl.BlockSpec((TM, Cp), lambda i: (i, 0)),
        compiler_params=pltpu.CompilerParams(
            dimension_semantics=("parallel",)),
    )(patches, w_flat, scale, shift)

    out = out[:NHW, :Cout].reshape(N, Ho, Wo, Cout)
    return jnp.transpose(out, (0, 3, 1, 2))  # back to NCHW


def _reference(x_nchw, weight, gamma, beta, *, padding=1, eps=1e-5):
    # Plain-JAX fp32 reference for validation.
    y = lax.conv_general_dilated(
        x_nchw, weight, window_strides=(1, 1),
        padding=[(padding, padding), (padding, padding)],
        dimension_numbers=("NCHW", "OIHW", "NCHW"))
    mean = jnp.mean(y, axis=(0, 2, 3), keepdims=True)
    var = jnp.mean((y - mean) ** 2, axis=(0, 2, 3), keepdims=True)
    yn = (y - mean) * lax.rsqrt(var + eps)
    yn = yn * gamma.reshape(1, -1, 1, 1) + beta.reshape(1, -1, 1, 1)
    return jnp.maximum(yn, 0.0)


if __name__ == "__main__":
    key = jax.random.PRNGKey(0)
    k_x, k_w, k_g, k_b = jax.random.split(key, 4)

    # BasicConv(in_planes=4, out_planes=8, kernel_size=3, stride=1, padding=1)
    N, Cin, H, W = 2, 4, 16, 16
    Cout, KH, KW = 8, 3, 3

    x = jax.random.normal(k_x, (N, Cin, H, W), jnp.float32)
    fan_in = Cin * KH * KW
    weight = jax.random.normal(k_w, (Cout, Cin, KH, KW), jnp.float32) / np.sqrt(fan_in)
    gamma = 1.0 + 0.1 * jax.random.normal(k_g, (Cout,), jnp.float32)
    beta = 0.1 * jax.random.normal(k_b, (Cout,), jnp.float32)

    out = basic_conv_forward(x, weight, gamma, beta, padding=1)
    out = jax.block_until_ready(out)

    ref = jax.block_until_ready(_reference(x, weight, gamma, beta, padding=1))
    # bf16 MXU operands (fp32 accumulation) -> loosened tolerance vs fp32 ref.
    np.testing.assert_allclose(np.asarray(out), np.asarray(ref), rtol=3e-2, atol=3e-2)

    print("KERNEL_OK")
</pallas_src>

<mosaic_0001>
module attributes {stable_mosaic.version = 11 : i64} {
  func.func @_conv_stats_kernel(%arg0: i32, %arg1: memref<256x36xbf16, #tpu.memory_space<vmem>>, %arg2: memref<36x128xbf16, #tpu.memory_space<vmem>>, %arg3: memref<8x128xf32, #tpu.memory_space<vmem>>, %arg4: memref<8x128xf32, #tpu.memory_space<vmem>>) attributes {dimension_semantics = [#tpu.dimension_semantics<parallel>], iteration_bounds = array<i64: 2>, scalar_prefetch = 0 : i64, scratch_operands = 0 : i64, tpu.core_type = #tpu.core_type<tc>, window_params = [{transform_indices = @transform_0, window_bounds = array<i64: 256, 36>}, {pipeline_mode = #tpu.pipeline_mode<synchronous>, transform_indices = @transform_1, window_bounds = array<i64: 36, 128>}, {transform_indices = @transform_2, window_bounds = array<i64: 8, 128>}, {transform_indices = @transform_3, window_bounds = array<i64: 8, 128>}]} {
    %c0 = arith.constant 0 : index
    %c0_0 = arith.constant 0 : index
    %0 = vector.load %arg1[%c0, %c0_0] : memref<256x36xbf16, #tpu.memory_space<vmem>>, vector<256x36xbf16>
    %c0_1 = arith.constant 0 : index
    %c0_2 = arith.constant 0 : index
    %1 = vector.load %arg2[%c0_1, %c0_2] : memref<36x128xbf16, #tpu.memory_space<vmem>>, vector<36x128xbf16>
    %cst = arith.constant dense<0.000000e+00> : vector<256x128xf32>
    %2 = tpu.matmul %0, %1, %cst {dimension_numbers = #tpu.dot_dimension_numbers<[1], [0], [0], [1], [0, 0, 1, 1], [], []>} : vector<256x36xbf16>, vector<36x128xbf16>, vector<256x128xf32> -> vector<256x128xf32>
    %3 = vector.shape_cast %2 : vector<256x128xf32> to vector<32x8x128xf32>
    %cst_3 = arith.constant dense<0.000000e+00> : vector<8x128xf32>
    %4 = vector.multi_reduction <add>, %3, %cst_3 [0] : vector<32x8x128xf32> to vector<8x128xf32>
    %c0_4 = arith.constant 0 : index
    %c0_5 = arith.constant 0 : index
    %5 = vector.load %arg3[%c0_4, %c0_5] : memref<8x128xf32, #tpu.memory_space<vmem>>, vector<8x128xf32>
    tpu.vector_store %arg3[%c0_4, %c0_5], %4 {strides = array<i32>} : memref<8x128xf32, #tpu.memory_space<vmem>>, vector<8x128xf32>,
    %6 = arith.mulf %3, %3 : vector<32x8x128xf32>
    %cst_6 = arith.constant dense<0.000000e+00> : vector<8x128xf32>
    %7 = vector.multi_reduction <add>, %6, %cst_6 [0] : vector<32x8x128xf32> to vector<8x128xf32>
    %c0_7 = arith.constant 0 : index
    %c0_8 = arith.constant 0 : index
    %8 = vector.load %arg4[%c0_7, %c0_8] : memref<8x128xf32, #tpu.memory_space<vmem>>, vector<8x128xf32>
    tpu.vector_store %arg4[%c0_7, %c0_8], %7 {strides = array<i32>} : memref<8x128xf32, #tpu.memory_space<vmem>>, vector<8x128xf32>,
    return
  }
  func.func @transform_0(%arg0: i32) -> (i32, i32) {
    %c0_i32 = arith.constant 0 : i32
    %c0_i32_0 = arith.constant 0 : i32
    return %arg0, %c0_i32 : i32, i32
  }
  func.func @transform_1(%arg0: i32) -> (i32, i32) {
    %c0_i32 = arith.constant 0 : i32
    %c0_i32_0 = arith.constant 0 : i32
    %c0_i32_1 = arith.constant 0 : i32
    return %c0_i32, %c0_i32_0 : i32, i32
  }
  func.func @transform_2(%arg0: i32) -> (i32, i32) {
    %c0_i32 = arith.constant 0 : i32
    %c0_i32_0 = arith.constant 0 : i32
    return %arg0, %c0_i32 : i32, i32
  }
  func.func @transform_3(%arg0: i32) -> (i32, i32) {
    %c0_i32 = arith.constant 0 : i32
    %c0_i32_0 = arith.constant 0 : i32
    return %arg0, %c0_i32 : i32, i32
  }
}

</mosaic_0001>

<bundles_post_ra>
// kernel: tpu_custom_call.1
= control target key start
LH: loop header
LB: loop body
LE: loop exit
PB: predicated region body
PF: predicated region fallthrough
CT: control target
= control target key end

     0   :  { %9 = vsyncpa [#allocation3], 0  ;;  %s1252_s0 = inlined_call_operand.vmem [shape: bf16[512,36], index: 0, kind: input, shape index: {}]   ;;  %s1253_s1 = inlined_call_operand.vmem [shape: bf16[36,128], index: 1, kind: input, shape index: {}]   ;;  %s1254_s2 = inlined_call_operand.hbm [shape: f32[16,128], index: 2, kind: output, shape index: {0}]   ;;  %s1255_s3 = inlined_call_operand.hbm [shape: f32[16,128], index: 3, kind: output, shape index: {1}]  }
   0x1   :  { %11 = vsyncpa [#allocation3 + $0x1], 0 }
   0x2   :  { %12 = vsyncpa [#allocation5], 0 }
   0x3   :  { %14 = vsyncpa [#allocation5 + $0x1], 0  ;;  %s1043_s12 = smov 0   ;;  %s1045_s13 = smov 0  }
   0x4   :  { %s1047_s14 = smov 0   ;;  %s1049_s15 = smov 0  }
   0x5 LB: > { %s1064_s16 = sadd.s32 4294967295, %s1019_s15   ;;  %s748_s17 = sadd.s32 4294967294, %s1019_s15   ;;  %s1019_s15 = sphi %s1049_s15, %s1261_s15   ;;  %s1015_s14 = sphi %s1047_s14, %s1260_s14   ;;  %s1011_s13 = sphi %s1045_s13, %s1259_s13   ;;  %s1007_s12 = sphi %s1043_s12, %s1258_s12  }
   0x6   : > { %s1068_s18 = sadd.s32 1, %s1019_s15   ;;  %s74_s19 = sadd.s32 1, %s1015_s14 }
   0x7   : > { %s71_s20 = ssub.s32 %s1019_s15, %s1068_s18  ;;  %p84_p0 = scmp.ne.s32.totalorder %s1015_s14, %s1011_s13 }
   0x8   : > { %p72_p1 = scmp.eq.s32.totalorder %s71_s20, 0  ;;  %p85_p2 = scmp.eq.s32.totalorder %s1064_s16, 1 }
   0x9   : > { %p90_p3 = scmp.ne.s32.totalorder %s1011_s13, %s1007_s12  ;;  %p91_p4 = scmp.eq.s32.totalorder %s748_s17, 1 }
   0xa   : > { %s1079_s21 = scalar_select %p72_p1, %s1015_s14, %s74_s19  }
   0xb   : > { %p1081_p5 = por %p85_p2, %p84_p0  ;;  %p1085_p6 = por %p91_p4, %p90_p3 }
   0xc   : > { %p751_p7 = scmp.ge.s32.totalorder %s1019_s15, 1  ;;  %p147_p8 = scmp.lt.s32.totalorder %s1019_s15, 3 }
   0xe   : > { %p148_p9 = pnand %p751_p7, %p147_p8 }
   0xf   : > { %v906_v0 = vld [vmem:[%s1253_s1] sm:$0xff] (!%p148_p9)   ;;  %v907_v1 = vld [vmem:[%s1253_s1 + $0x8] sm:$0xff] (!%p148_p9)   ;;  %s754_s28 = sshll.u32 (!%p148_p9), %s1064_s16, 5  ;;  %v908_v2 = vld [vmem:[%s1253_s1 + $0x10] ss:$0 sps:$4 sm:$0x33] (!%p148_p9)  }
  0x10   : > { %151 = sbr.rel (%p148_p9) target bundleno = 342 (0x156), region = 28  ;;  %816 = vmatprep.subr.bf16.mxu0 (!%p148_p9), %v906_v0  ;;  %p177_p10 = scmp.lt.s32.totalorder (!%p148_p9), %s754_s28, 63  ;;  %854 = vmatprep.subr.bf16.mxu1 (!%p148_p9), %v906_v0  ;;  %vm364_vm0 = vcmask (!%p148_p9), 1041408   ;;  %vm315_vm1 = vcmask (!%p148_p9), 293888  }
  0x11   : > { %817 = vmatpush3.bf16.msra.mxu0 (!%p148_p9), %v906_v0  ;;  %857 = vmatpush3.bf16.msra.mxu1 (!%p148_p9), %v906_v0  ;;  %v366_v3 = vsel (!%p148_p9), %vm364_vm0, %v908_v2, 0  ;;  %s1169_s8 = sand.u32 (!%p148_p9), 1, %s1011_s13   ;;  %s793_s10 = sshll.u32 (!%p148_p9), %s1064_s16, 7 }
  0x12   : > { %818 = vmatprep.subr.bf16.mxu0 (!%p148_p9), %v907_v1  ;;  %855 = vmatprep.subr.bf16.mxu1 (!%p148_p9), %v907_v1  ;;  %s752_s9 = sshll.u32 (!%p148_p9), %s1169_s8, 3  ;;  %s1179_s26 = scalar_lea.hbm (!%p148_p9), %s1254_s2, %s793_s10 }
  0x13   : > { %s168_s11 = scalar_lea.vmem (!%p148_p9), [#allocation2], %s752_s9  ;;  %s1173_s19 = scalar_lea.vmem (!%p148_p9), [#allocation4], %s752_s9 }
  0x14   : > { %s644_s17 = sshll.u32 (!%p148_p9), %s168_s11, 4  ;;  %s657_s20 = sshll.u32 (!%p148_p9), %s1173_s19, 4  ;;  %s1181_s17 = int_to_ptr.vmem [resolvable:$true] %s644_s17  ;;  %s1188_s20 = int_to_ptr.vmem [resolvable:$true] %s657_s20 }
  0x15   : > { %819 = vmatpush3.bf16.msra.mxu0 (!%p148_p9), %v907_v1  ;;  %858 = vmatpush3.bf16.msra.mxu1 (!%p148_p9), %v907_v1  ;;  %s626_s29 = scalar_lea.sflag (!%p148_p9), [#allocation3], %s1169_s8  ;;  %s925_s30 = scalar_lea.vmem (!%p148_p9), %s1181_s17, 128 }
  0x16   : > { %860 = vmatprep.subr.msk.bf16.mxu0 (!%p148_p9), %vm364_vm0, %v908_v2  ;;  %861 = vmatprep.subr.msk.bf16.mxu1 (!%p148_p9), %vm364_vm0, %v908_v2  ;;  %p926_p11 = scmp.ne.s32.totalorder (!%p148_p9), %s1181_s17, %s925_s30 }
  0x17   : > { %s1263_s28 = smov (!%p177_p10, %s754_s28), 63 }
  0x18   : > { %s755_s4 = sshll.u32 %s1263_s28, 2  ;;  %s1186_s28 = scalar_lea.hbm %s1255_s3, %s793_s10 }
  0x19   : > { %s1104_s7 = scalar_lea.vmem %s1252_s0, %s755_s4  ;;  %821 = vmatpush3.bf16.msra.mxu0 %v366_v3  ;;  %859 = vmatpush3.bf16.msra.mxu1 %v366_v3  ;;  %p927_p12 = pnand %p926_p11, %p1081_p5 }
  0x1a   : > { %v909_v4 = vld [vmem:[%s1104_s7] sm:$0xff]   ;;  %v910_v5 = vld [vmem:[%s1104_s7 + $0x8] sm:$0xff]   ;;  %v911_v6 = vld [vmem:[%s1104_s7 + $0x10] sm:$0xff]   ;;  %s1021_s4 = smov [#allocation2]  }
  0x1b   : > { %822 = vmatprep.mubr.msk.bf16.mxu0 %vm315_vm1, %v909_v4  ;;  %v912_v7 = vld [vmem:[%s1104_s7 + $0x18] sm:$0xff]   ;;  %v917_v8 = vld [vmem:[%s1104_s7 + $0x40] sm:$0xff]   ;;  %v918_v9 = vld [vmem:[%s1104_s7 + $0x48] sm:$0xff]   ;;  %p928_p13 = pneg %p927_p12  ;;  %s929_s5 = sshll.u32 %s1021_s4, 4  ;;  %s930_s5 = int_to_ptr.vmem [resolvable:$false] %s929_s5 }
  0x1c   : > { %823 = vmatmul.mubr.msk.bf16.vlgmr.msra.gmra.mrb[0].mxu0 %vm315_vm1, %v910_v5  ;;  %838 = vmatprep.mubr.msk.bf16.mxu1 %vm315_vm1, %v917_v8  ;;  %v919_v10 = vld [vmem:[%s1104_s7 + $0x50] sm:$0xff]   ;;  %v913_v11 = vld [vmem:[%s1104_s7 + $0x20] sm:$0xff]   ;;  %v920_v12 = vld [vmem:[%s1104_s7 + $0x58] sm:$0xff]   ;;  %s931_s6 = scalar_lea.vmem %s930_s5, 256  ;;  %p932_p0 = scmp.lt.s32.totalorder %s1181_s17, %s930_s5 }
  0x1d   : > { %826 = vmatprep.mubr.msk.bf16.mxu0 %vm315_vm1, %v911_v6  ;;  %839 = vmatmul.mubr.msk.bf16.vlgmr.msra.gmra.mrb[0].mxu1 %vm315_vm1, %v918_v9  ;;  %v921_v13 = vld [vmem:[%s1104_s7 + $0x60] sm:$0xff]   ;;  %v914_v14 = vld [vmem:[%s1104_s7 + $0x28] sm:$0xff]   ;;  %v915_v15 = vld [vmem:[%s1104_s7 + $0x30] sm:$0xff]   ;;  %p933_p1 = scmp.lt.s32.totalorder %s931_s6, %s925_s30 }
  0x1e   : > { %842 = vmatprep.mubr.msk.bf16.mxu1 %vm315_vm1, %v919_v10  ;;  %v922_v16 = vld [vmem:[%s1104_s7 + $0x68] sm:$0xff]   ;;  %v923_v17 = vld [vmem:[%s1104_s7 + $0x70] sm:$0xff]   ;;  %v916_v18 = vld [vmem:[%s1104_s7 + $0x38] sm:$0xff]  }
  0x1f   : > { %v924_v19 = vld [vmem:[%s1104_s7 + $0x78] sm:$0xff]   ;;  %p934_p2 = por %p933_p1, %p932_p0 }
  0x21   : > { %p935_p3 = pnand %p934_p2, %p928_p13 }
  0x24   : > { %827 = vmatmul.mubr.msk.bf16.gmra.mrb[4].mxu0 %vm315_vm1, %v912_v7 }
  0x25   : > { %830 = vmatprep.mubr.msk.bf16.mxu0 %vm315_vm1, %v913_v11  ;;  %843 = vmatmul.mubr.msk.bf16.gmra.mrb[4].mxu1 %vm315_vm1, %v920_v12 }
  0x26   : > { %846 = vmatprep.mubr.msk.bf16.mxu1 %vm315_vm1, %v921_v13 }
  0x2c   : > { %831 = vmatmul.mubr.msk.bf16.gmra.mrb[8].mxu0 %vm315_vm1, %v914_v14 }
  0x2d   : > { %834 = vmatprep.mubr.msk.bf16.mxu0 %vm315_vm1, %v915_v15  ;;  %847 = vmatmul.mubr.msk.bf16.gmra.mrb[8].mxu1 %vm315_vm1, %v922_v16 }
  0x2e   : > { %850 = vmatprep.mubr.msk.bf16.mxu1 %vm315_vm1, %v923_v17 }
  0x34   : > { %835 = vmatmul.mubr.msk.bf16.gmra.mrb[12].mxu0 %vm315_vm1, %v916_v18 }
  0x35   : > { %851 = vmatmul.mubr.msk.bf16.gmra.mrb[12].mxu1 %vm315_vm1, %v924_v19 }
  0xef   : > { %v824_v20 = vpop.f32.mrb[0].mxu0 }
  0xf0   : > { %v402_v21 = vpop.f32.mrb[1].mxu0  ;;  %v1138_v27 = vpop.f32.mrb[0].mxu1  ;;  %v563_v28 = vmul.f32 %v824_v20, %v824_v20 }
  0xf1   : > { %v825_v22 = vpop.f32.mrb[2].mxu0  ;;  %v561_v24 = vmul.f32 %v402_v21, %v402_v21  ;;  %v1140_v31 = vpop.f32.mrb[1].mxu1 }
  0xf2   : > { %v405_v23 = vpop.f32.mrb[3].mxu0  ;;  %v1142_v32 = vpop.f32.mrb[2].mxu1  ;;  %v564_v33 = vmul.f32 %v825_v22, %v825_v22 }
  0xf3   : > { %v529_v25 = vadd.f32 %v405_v23, %v402_v21  ;;  %v562_v26 = vmul.f32 %v405_v23, %v405_v23  ;;  %v1144_v37 = vpop.f32.mrb[3].mxu1 }
  0xf5   : > { %v530_v29 = vadd.f32 %v824_v20, %v529_v25  ;;  %v593_v30 = vadd.f32 %v562_v26, %v561_v24 }
  0xf7   : > { %v594_v34 = vadd.f32 %v593_v30, %v563_v28  ;;  %v828_v35 = vpop.f32.mrb[4].mxu0  ;;  %v531_v36 = vadd.f32 %v825_v22, %v530_v29 }
  0xf8   : > { %v418_v38 = vpop.f32.mrb[5].mxu0  ;;  %v1146_v47 = vpop.f32.mrb[4].mxu1  ;;  %v567_v48 = vmul.f32 %v828_v35, %v828_v35 }
  0xf9   : > { %v532_v39 = vadd.f32 %v531_v36, %v418_v38  ;;  %v565_v40 = vmul.f32 %v418_v38, %v418_v38  ;;  %v595_v41 = vadd.f32 %v594_v34, %v564_v33  ;;  %v829_v42 = vpop.f32.mrb[6].mxu0  ;;  %v482_v51 = vpop.f32.mrb[5].mxu1 }
  0xfa   : > { %v421_v43 = vpop.f32.mrb[7].mxu0  ;;  %v1148_v52 = vpop.f32.mrb[6].mxu1  ;;  %v568_v53 = vmul.f32 %v829_v42, %v829_v42 }
  0xfb   : > { %v596_v44 = vadd.f32 %v595_v41, %v565_v40  ;;  %v533_v45 = vadd.f32 %v532_v39, %v421_v43  ;;  %v566_v46 = vmul.f32 %v421_v43, %v421_v43  ;;  %v485_v57 = vpop.f32.mrb[7].mxu1  ;;  %v579_v43 = vmul.f32 %v1138_v27, %v1138_v27 }
  0xfd   : > { %v534_v49 = vadd.f32 %v828_v35, %v533_v45  ;;  %v597_v50 = vadd.f32 %v596_v44, %v566_v46  ;;  %v577_v35 = vmul.f32 %v1140_v31, %v1140_v31  ;;  %v580_v46 = vmul.f32 %v1142_v32, %v1142_v32 }
  0xff   : > { %v598_v54 = vadd.f32 %v597_v50, %v567_v48  ;;  %v832_v55 = vpop.f32.mrb[8].mxu0  ;;  %v535_v56 = vadd.f32 %v829_v42, %v534_v49  ;;  %v578_v42 = vmul.f32 %v1144_v37, %v1144_v37 }
 0x100   : > { %v434_v58 = vpop.f32.mrb[9].mxu0  ;;  %v848_v3 = vpop.f32.mrb[8].mxu1  ;;  %v571_v4 = vmul.f32 %v832_v55, %v832_v55 }
 0x101   : > { %v536_v59 = vadd.f32 %v535_v56, %v434_v58  ;;  %v569_v60 = vmul.f32 %v434_v58, %v434_v58  ;;  %v599_v61 = vadd.f32 %v598_v54, %v568_v53  ;;  %v833_v62 = vpop.f32.mrb[10].mxu0  ;;  %v498_v7 = vpop.f32.mrb[9].mxu1  ;;  %v582_v56 = vmul.f32 %v485_v57, %v485_v57 }
 0x102   : > { %v437_v63 = vpop.f32.mrb[11].mxu0  ;;  %v849_v8 = vpop.f32.mrb[10].mxu1  ;;  %v572_v9 = vmul.f32 %v833_v62, %v833_v62 }
 0x103   : > { %v600_v0 = vadd.f32 %v599_v61, %v569_v60  ;;  %v537_v1 = vadd.f32 %v536_v59, %v437_v63  ;;  %v570_v2 = vmul.f32 %v437_v63, %v437_v63  ;;  %v501_v13 = vpop.f32.mrb[11].mxu1  ;;  %v584_v59 = vmul.f32 %v1148_v52, %v1148_v52 }
 0x105   : > { %v538_v5 = vadd.f32 %v832_v55, %v537_v1  ;;  %v601_v6 = vadd.f32 %v600_v0, %v570_v2  ;;  %v586_v1 = vmul.f32 %v501_v13, %v501_v13 }
 0x107   : > { %v602_v10 = vadd.f32 %v601_v6, %v571_v4  ;;  %v836_v11 = vpop.f32.mrb[12].mxu0  ;;  %v539_v12 = vadd.f32 %v833_v62, %v538_v5  ;;  %v588_v4 = vmul.f32 %v849_v8, %v849_v8 }
 0x108   : > { %v450_v14 = vpop.f32.mrb[13].mxu0  ;;  %v852_v23 = vpop.f32.mrb[12].mxu1  ;;  %v575_v24 = vmul.f32 %v836_v11, %v836_v11 }
 0x109   : > { %v540_v15 = vadd.f32 %v539_v12, %v450_v14  ;;  %v573_v16 = vmul.f32 %v450_v14, %v450_v14  ;;  %v603_v17 = vadd.f32 %v602_v10, %v572_v9  ;;  %v837_v18 = vpop.f32.mrb[14].mxu0  ;;  %v514_v28 = vpop.f32.mrb[13].mxu1 }
 0x10a   : > { %v453_v19 = vpop.f32.mrb[15].mxu0  ;;  %v853_v29 = vpop.f32.mrb[14].mxu1  ;;  %v576_v30 = vmul.f32 %v837_v18, %v837_v18  ;;  %v589_v9 = vmul.f32 %v514_v28, %v514_v28 }
 0x10b   : > { %v604_v20 = vadd.f32 %v603_v17, %v573_v16  ;;  %v541_v21 = vadd.f32 %v540_v15, %v453_v19  ;;  %v574_v22 = vmul.f32 %v453_v19, %v453_v19  ;;  %v517_v36 = vpop.f32.mrb[15].mxu1 }
 0x10c   : > { %v590_v12 = vmul.f32 %v517_v36, %v517_v36 }
 0x10d   : > { %v542_v25 = vadd.f32 %v836_v11, %v541_v21  ;;  %v605_v26 = vadd.f32 %v604_v20, %v574_v22 }
 0x10f   : > { %v606_v33 = vadd.f32 %v605_v26, %v575_v24  ;;  %v543_v34 = vadd.f32 %v837_v18, %v542_v25 }
 0x111   : > { %v544_v38 = vadd.f32 %v543_v34, %v1140_v31  ;;  %v607_v39 = vadd.f32 %v606_v33, %v576_v30  ;;  %v581_v31 = vmul.f32 %v482_v51, %v482_v51 }
 0x113   : > { %v608_v40 = vadd.f32 %v607_v39, %v577_v35  ;;  %v545_v41 = vadd.f32 %v544_v38, %v1144_v37  ;;  %v583_v37 = vmul.f32 %v1146_v47, %v1146_v47 }
 0x115   : > { %v546_v44 = vadd.f32 %v1138_v27, %v545_v41  ;;  %v609_v45 = vadd.f32 %v608_v40, %v578_v42 }
 0x117   : > { %v610_v48 = vadd.f32 %v609_v45, %v579_v43  ;;  %v547_v49 = vadd.f32 %v1142_v32, %v546_v44  ;;  %v585_v32 = vmul.f32 %v498_v7, %v498_v7 }
 0x119   : > { %v548_v50 = vadd.f32 %v547_v49, %v482_v51  ;;  %v611_v53 = vadd.f32 %v610_v48, %v580_v46 }
 0x11b   : > { %v612_v54 = vadd.f32 %v611_v53, %v581_v31  ;;  %v549_v55 = vadd.f32 %v548_v50, %v485_v57  ;;  %v587_v57 = vmul.f32 %v848_v3, %v848_v3 }
 0x11d   : > { %v550_v58 = vadd.f32 %v1146_v47, %v549_v55  ;;  %v613_v27 = vadd.f32 %v612_v54, %v582_v56 }
 0x11f   : > { %v614_v60 = vadd.f32 %v613_v27, %v583_v37  ;;  %v551_v61 = vadd.f32 %v1148_v52, %v550_v58 }
 0x121   : > { %v552_v62 = vadd.f32 %v551_v61, %v498_v7  ;;  %v615_v51 = vadd.f32 %v614_v60, %v584_v59 }
 0x123   : > { %v616_v63 = vadd.f32 %v615_v51, %v585_v32  ;;  %v553_v0 = vadd.f32 %v552_v62, %v501_v13  ;;  %v591_v13 = vmul.f32 %v852_v23, %v852_v23 }
 0x125   : > { %v554_v2 = vadd.f32 %v848_v3, %v553_v0  ;;  %v617_v47 = vadd.f32 %v616_v63, %v586_v1  ;;  %v592_v3 = vmul.f32 %v853_v29, %v853_v29 }
 0x127   : > { %v618_v5 = vadd.f32 %v617_v47, %v587_v57  ;;  %v555_v6 = vadd.f32 %v849_v8, %v554_v2 }
 0x129   : > { %v556_v10 = vadd.f32 %v555_v6, %v514_v28  ;;  %v619_v52 = vadd.f32 %v618_v5, %v588_v4 }
 0x12b   : > { %v620_v11 = vadd.f32 %v619_v52, %v589_v9  ;;  %v557_v7 = vadd.f32 %v556_v10, %v517_v36 }
 0x12d   : > { %v558_v14 = vadd.f32 %v852_v23, %v557_v7  ;;  %v621_v15 = vadd.f32 %v620_v11, %v590_v12 }
 0x12f   : > { %v559_v8 = vadd.f32 %v853_v29, %v558_v14  ;;  %v622_v16 = vadd.f32 %v621_v15, %v591_v13 }
 0x131   : > { %560 = vst [vmem:[%s168_s11] sm:$0xff] %v559_v8  ;;  %v623_v17 = vadd.f32 %v622_v16, %v592_v3 }
 0x132   : > { %938 = shalt.err (!%p935_p3)
}
 0x133   : > { %s939_s7 = scalar_lea.hbm %s1179_s26, 128  ;;  %s943_s11 = scalar_lea.hbm %s1254_s2, 256 }
 0x134   : > { %p940_p4 = scmp.ne.s32.totalorder %s1179_s26, %s939_s7  ;;  %p944_p9 = scmp.lt.u32.totalorder %s1179_s26, %s1254_s2 }
 0x135   : > { %p945_p10 = scmp.lt.u32.totalorder %s943_s11, %s939_s7  ;;  %p947_p12 = scmp.lt.u32.totalorder %s939_s7, %s1179_s26 }
 0x136   : > { %p941_p7 = pnand %p940_p4, %p1081_p5 }
 0x137   : > { %p946_p11 = por %p945_p10, %p944_p9 }
 0x138   : > { %p942_p8 = pneg %p941_p7 }
 0x139   : > { %p948_p13 = por %p947_p12, %p946_p11 }
 0x13b   : > { %p949_p0 = pnand %p948_p13, %p942_p8 }
 0x13d   : > { %952 = shalt.err (!%p949_p0)
}
 0x13e   : > { %862 = dma.vmem_to_hbm [thread:$0]  (%p1081_p5), %s1181_s17, 128, %s1179_s26, %s626_s29   ;;  %624 = vst [vmem:[%s1173_s19] sm:$0xff] %v623_v17 }
 0x13f   : > { %s631_s16 = scalar_lea.sflag [#allocation5], %s1169_s8  ;;  %s953_s27 = scalar_lea.vmem %s1188_s20, 128 }
 0x140   : > { %p954_p1 = scmp.ne.s32.totalorder %s1188_s20, %s953_s27  ;;  %s1022_s30 = smov [#allocation4]  }
 0x141   : > { %s957_s4 = sshll.u32 %s1022_s30, 4  ;;  %s958_s4 = int_to_ptr.vmem [resolvable:$false] %s957_s4 }
 0x142   : > { %p955_p2 = pnand %p954_p1, %p1081_p5  ;;  %s959_s5 = scalar_lea.vmem %s958_s4, 256 }
 0x143   : > { %p960_p4 = scmp.lt.s32.totalorder %s1188_s20, %s958_s4  ;;  %p961_p7 = scmp.lt.s32.totalorder %s959_s5, %s953_s27 }
 0x144   : > { %p956_p3 = pneg %p955_p2 }
 0x145   : > { %p962_p8 = por %p961_p7, %p960_p4 }
 0x147   : > { %p963_p9 = pnand %p962_p8, %p956_p3 }
 0x149   : > { %966 = shalt.err (!%p963_p9)
}
 0x14a   : > { %s967_s8 = scalar_lea.hbm %s1186_s28, 128  ;;  %s971_s26 = scalar_lea.hbm %s1255_s3, 256 }
 0x14b   : > { %p968_p10 = scmp.ne.s32.totalorder %s1186_s28, %s967_s8  ;;  %p972_p13 = scmp.lt.u32.totalorder %s1186_s28, %s1255_s3 }
 0x14c   : > { %p973_p0 = scmp.lt.u32.totalorder %s971_s26, %s967_s8  ;;  %p975_p2 = scmp.lt.u32.totalorder %s967_s8, %s1186_s28 }
 0x14d   : > { %p969_p11 = pnand %p968_p10, %p1081_p5 }
 0x14e   : > { %p974_p1 = por %p973_p0, %p972_p13 }
 0x14f   : > { %p970_p12 = pneg %p969_p11 }
 0x150   : > { %p976_p3 = por %p975_p2, %p974_p1 }
 0x152   : > { %p977_p4 = pnand %p976_p3, %p970_p12 }
 0x154   : > { %980 = shalt.err (!%p977_p4)
}
 0x155   : > { %863 = dma.vmem_to_hbm [thread:$0]  (%p1081_p5), %s1188_s20, 128, %s1186_s28, %s631_s16  }
 0x156 PF: > { %p873_p7 = scmp.ge.s32.totalorder %s1019_s15, 2  ;;  %s669_s7 = sand.u32 1, %s1007_s12  }
 0x157   : > { %s670_s9 = scalar_lea.sflag [#allocation3], %s669_s7 }
 0x158   : > { %p867_p8 = pnand %p873_p7, %p1085_p6 }
 0x15a   : > { %998 = dma.done.wait (!%p867_p8), %s670_s9, 128  }
 0x15b   : > { %1000 = vsyncadd (!%p867_p8), %s670_s9, 4294967168  ;;  %s679_s10 = scalar_lea.sflag [#allocation5], %s669_s7 }
 0x15c   : > { %1002 = dma.done.wait (!%p867_p8), %s679_s10, 128  }
 0x15d   : > { %1004 = vsyncadd (!%p867_p8), %s679_s10, 4294967168  ;;  %p17_p5 = scmp.ge.s32.totalorder %s1068_s18, 4   ;;  %s1258_s12 = smov %s1011_s13 }
 0x15e   : > { %s1259_s13 = smov %s1015_s14  ;;  %s1260_s14 = smov %s1079_s21 }
 0x15f   : > { %s1261_s15 = smov %s1068_s18  ;;  %19 = sbr.rel (!%p17_p5) target bundleno = 5 (0x5), region = 80 }
 0x166   :  { %684 = vsyncpa [#allocation3], 1 }
 0x167   :  { %686 = vsyncpa [#allocation3 + $0x1], 1 }
 0x168   :  { %687 = vsyncpa [#allocation5], 1 }
 0x169   :  { %689 = vsyncpa [#allocation5 + $0x1], 1 }

</bundles_post_ra>
